<compile_context>
chip_gen: v6e
topology: v6e:2x2x1
jax: 0.10.0
libtpu: 0.0.40
codegen_flags: <defaults>
</compile_context>

<pallas_src>
import math

import jax
import jax.numpy as jnp
from jax.experimental import pallas as pl
from jax.experimental.pallas import tpu as pltpu


def _patch_merging_kernel(x_ref, we_ref, wo_ref, bias_ref, o_ref):
    # x_ref    : (tile_rp, 2, W2, 2C)  one contiguous row-pair block.
    #            hp=0 slab = [x0 | x2] channels, hp=1 slab = [x1 | x3] channels
    #            of the PyTorch torch.cat([x0, x1, x2, x3], -1) ordering.
    # we_ref   : (2C, 2C)  gamma-scaled reduction rows for the even slab (matmul dtype)
    # wo_ref   : (2C, 2C)  gamma-scaled reduction rows for the odd slab
    # bias_ref : (1, 2C)   f32, beta @ W (LayerNorm shift folded through the Linear)
    # o_ref    : (tile_rp * W2, 2C)
    f32 = jnp.float32
    tile_rp, _, w2, c2 = x_ref.shape
    tt = tile_rp * w2

    x4 = x_ref[...]
    # TODO(synk): for Swin stages where W2 % 8 != 0 (W2 = 28/14/7) this
    # (tile_rp, W2)->tokens fold crosses (8,128) vreg tiles and costs a relayout
    # per step; move to a rank-3 contraction / 3-D out block once the Mosaic
    # dot_general lowering supports it (audit with pl.lower_as_mlir).
    xe = x4[:, 0].astype(f32).reshape(tt, c2)     # even image rows  -> [x0 | x2]
    xo = x4[:, 1].astype(f32).reshape(tt, c2)     # odd  image rows  -> [x1 | x3]

    # LayerNorm(4C) statistics over the two 2C slabs (two-pass f32, biased
    # variance, eps=1e-5 -- PyTorch defaults). xce/xco reused for var + normalize.
    inv_c4 = 1.0 / (2.0 * c2)                     # 1 / (4*C)
    mean = (jnp.sum(xe, axis=-1, keepdims=True)
            + jnp.sum(xo, axis=-1, keepdims=True)) * inv_c4
    xce = xe - mean
    xco = xo - mean
    var = (jnp.sum(xce * xce, axis=-1, keepdims=True)
           + jnp.sum(xco * xco, axis=-1, keepdims=True)) * inv_c4
    inv = jax.lax.rsqrt(var + 1e-5)

    # LN affine is folded into we/wo/bias in the wrapper: only the normalize
    # multiply remains on the VPU before the MXU.
    ye = (xce * inv).astype(we_ref.dtype)
    yo = (xco * inv).astype(wo_ref.dtype)

    acc = jnp.dot(ye, we_ref[...], preferred_element_type=f32)
    acc = acc + jnp.dot(yo, wo_ref[...], preferred_element_type=f32)
    acc = acc + bias_ref[...].astype(f32)
    o_ref[...] = acc.astype(o_ref.dtype)


def _round_up(a, b):
    return (a + b - 1) // b * b


def _vmem_capacity_bytes():
    try:
        cap = getattr(pltpu.get_tpu_info(), "vmem_capacity_bytes", None)
        if cap:
            return int(cap)
    except Exception:
        pass
    return 64 << 20          # conservative fallback (v7x per-core VMEM)


def _choose_tile_rp(RP, W2, target_tokens):
    """Pick row-pairs per grid step.

    1. Prefer the largest divisor of RP <= min(target, RP//2) whose token count
       is a multiple of 8: the grid divides exactly (no padded HBM copy of x,
       no partial blocks) and there are >= 2 steps for v7x's two TensorCores.
    2. Otherwise use a multiple-of-`sub` tile with Pallas partial boundary
       blocks (grid = cdiv): OOB rows of the last block are computed on garbage
       but dropped by the masked output write; rows are independent so valid
       rows are unaffected. No jnp.pad in either path.
    Returns (tile_rp, grid_len).
    """
    sub = 8 // math.gcd(W2, 8)
    target_rp = max(sub, (max(1, target_tokens // W2) // sub) * sub)
    upper = max(1, min(target_rp, RP // 2)) if RP >= 2 else RP
    for d in range(upper, 0, -1):
        if RP % d == 0 and ((d * W2) % 8 == 0 or d == RP):
            if d * W2 * 4 >= min(target_tokens, RP * W2):
                return d, RP // d
            break                                   # only smaller divisors left
    tile_rp = max(sub, min(target_rp, _round_up(pl.cdiv(RP, 2), sub)))
    return tile_rp, pl.cdiv(RP, tile_rp)


def patch_merging(x, gamma, beta, w_t, input_resolution, *,
                  target_tile_tokens=None, matmul_dtype=jnp.bfloat16):
    """x: (B, H*W, C) -> (B, H*W//4, 2*C).  w_t = transposed Linear weight (4C, 2C)."""
    H, W = input_resolution
    B, L, C = x.shape
    assert L == H * W, "input feature has wrong size"
    assert H % 2 == 0 and W % 2 == 0, f"x size ({H}*{W}) are not even."
    H2, W2 = H // 2, W // 2
    RP = B * H2                   # number of 2-row "row pairs"
    C2 = 2 * C
    M = RP * W2                   # number of merged tokens

    # Zero-copy contiguous view: (B, H, W, C) -> (rp, hp, w2, wp*C + c).
    x5 = x.reshape(RP, 2, W2, C2)

    # Generation-aware sizing: bigger tiles on 128 MiB parts (v5e/v6e), VMEM
    # headroom on 64 MiB parts (v7x).
    vmem_cap = _vmem_capacity_bytes()
    if target_tile_tokens is None:
        target_tile_tokens = 1024 if vmem_cap > (64 << 20) else 512

    isz_x = jnp.dtype(x.dtype).itemsize
    isz_w = jnp.dtype(matmul_dtype).itemsize
    budget = max(vmem_cap - (16 << 20), 16 << 20)   # leave Mosaic scratch headroom
    # per-token VMEM: input rows (2 x C2, double-buffered) + output row
    # (double-buffered) + ~8 f32-equivalent temporaries (xe/xo/xce/xco/ye/yo/acc).
    per_token = C2 * (4 * isz_x + 2 * isz_x + 8 * 4)
    fixed = 2 * 2 * C2 * C2 * isz_w + 2 * 4 * C2    # weights (dbl-buffered) + bias
    max_tokens = max(W2, (budget - fixed) // per_token)

    tile_rp, grid0 = _choose_tile_rp(RP, W2, min(target_tile_tokens, max_tokens))
    tile_tokens = tile_rp * W2

    est = tile_tokens * per_token + fixed
    vmem_limit = int(min(max(est + (8 << 20), 32 << 20), budget))

    # Fold LayerNorm affine into the reduction:
    #   out = ((x - mu) * inv * gamma + beta) @ W
    #       = ((x - mu) * inv) @ (gamma[:, None] * W)  +  beta @ W
    # with rows permuted so each parity slab is consumed contiguously:
    #   even slab -> 4C rows [0:C) u [2C:3C),  odd slab -> [C:2C) u [3C:4C).
    g = gamma.astype(jnp.float32)
    b = beta.astype(jnp.float32)
    wt = w_t.astype(jnp.float32)
    ge = jnp.concatenate([g[:C], g[2 * C:3 * C]])
    go = jnp.concatenate([g[C:2 * C], g[3 * C:]])
    be = jnp.concatenate([b[:C], b[2 * C:3 * C]])
    bo = jnp.concatenate([b[C:2 * C], b[3 * C:]])
    we = jnp.concatenate([wt[:C], wt[2 * C:3 * C]], axis=0)    # (2C, 2C) f32
    wo = jnp.concatenate([wt[C:2 * C], wt[3 * C:]], axis=0)
    bias = (be @ we + bo @ wo).reshape(1, C2)                  # exact f32 shift
    we_s = (ge[:, None] * we).astype(matmul_dtype)
    wo_s = (go[:, None] * wo).astype(matmul_dtype)

    out = pl.pallas_call(
        _patch_merging_kernel,
        out_shape=jax.ShapeDtypeStruct((M, C2), x.dtype),
        grid_spec=pltpu.PrefetchScalarGridSpec(
            num_scalar_prefetch=0,
            grid=(grid0,),
            in_specs=[
                # One contiguous DMA per step: both parities of the row-pair slab.
                pl.BlockSpec((tile_rp, 2, W2, C2), lambda i: (i, 0, 0, 0)),
                # Constant-index operands (fetched once; default buffering).
                pl.BlockSpec((C2, C2), lambda i: (0, 0)),
                pl.BlockSpec((C2, C2), lambda i: (0, 0)),
                pl.BlockSpec((1, C2), lambda i: (0, 0)),
            ],
            out_specs=pl.BlockSpec((tile_tokens, C2), lambda i: (i, 0)),
        ),
        compiler_params=pltpu.CompilerParams(
            dimension_semantics=("parallel",),
            vmem_limit_bytes=vmem_limit,
        ),
    )(x5, we_s, wo_s, bias)

    return out.reshape(B, L // 4, C2)


def _reference(x, gamma, beta, w_t, input_resolution, matmul_dtype=jnp.bfloat16):
    """Pure-JAX reference matching the PyTorch forward (matmul in matmul_dtype)."""
    H, W = input_resolution
    B, L, C = x.shape
    xv = x.reshape(B, H, W, C)
    xm = jnp.concatenate(
        [xv[:, 0::2, 0::2, :], xv[:, 1::2, 0::2, :],
         xv[:, 0::2, 1::2, :], xv[:, 1::2, 1::2, :]], axis=-1
    ).reshape(B, L // 4, 4 * C).astype(jnp.float32)
    mean = jnp.mean(xm, axis=-1, keepdims=True)
    var = jnp.mean((xm - mean) ** 2, axis=-1, keepdims=True)
    y = (xm - mean) * jax.lax.rsqrt(var + 1e-5) * gamma + beta
    out = jnp.dot(y.astype(matmul_dtype), w_t.astype(matmul_dtype),
                  preferred_element_type=jnp.float32)
    return out.astype(x.dtype)


def _run_case(key, B, H, W, C, **kw):
    kx, kg, kb, kw_ = jax.random.split(key, 4)
    x = jax.random.normal(kx, (B, H * W, C), dtype=jnp.float32)
    gamma = 1.0 + 0.1 * jax.random.normal(kg, (4 * C,), dtype=jnp.float32)
    beta = 0.1 * jax.random.normal(kb, (4 * C,), dtype=jnp.float32)
    # PyTorch Linear weight is (2C, 4C); the kernel consumes its transpose (4C, 2C).
    w = jax.random.normal(kw_, (2 * C, 4 * C), dtype=jnp.float32) / jnp.sqrt(4.0 * C)
    w_t = w.T

    out = jax.block_until_ready(patch_merging(x, gamma, beta, w_t, (H, W), **kw))
    ref = _reference(x, gamma, beta, w_t, (H, W))
    assert out.shape == (B, (H * W) // 4, 2 * C), out.shape
    # Kernel folds the LN affine into bf16 weights (bias added exactly in f32);
    # differences vs the reference factorization are bf16-rounding level.
    assert jnp.allclose(out, ref, atol=3e-2, rtol=3e-2), \
        float(jnp.max(jnp.abs(out - ref)))


if __name__ == "__main__":
    key = jax.random.PRNGKey(0)
    k1, k2 = jax.random.split(key)
    # Case 1: B=2, 16x16, C=64 -> exact-divisor tiling, 2 grid steps (keeps both
    #         v7x TensorCores busy), lane-dense 2C=128 output.
    _run_case(k1, B=2, H=16, W=16, C=64)
    # Case 2: non-square B=1, 26x16, C=64 -> RP=13 has no usable divisor, so this
    #         exercises the no-pad partial-boundary-block path (multi-tile with a
    #         ragged last block) that replaces the old jnp.pad fallback.
    _run_case(k2, B=1, H=26, W=16, C=64)
    print("KERNEL_OK")
</pallas_src>

<mosaic_0001>
module attributes {stable_mosaic.version = 11 : i64} {
  func.func @_patch_merging_kernel(%arg0: i32, %arg1: memref<8x2x8x128xf32, #tpu.memory_space<vmem>>, %arg2: memref<128x128xbf16, #tpu.memory_space<vmem>>, %arg3: memref<128x128xbf16, #tpu.memory_space<vmem>>, %arg4: memref<1x128xf32, #tpu.memory_space<vmem>>, %arg5: memref<64x128xf32, #tpu.memory_space<vmem>>) attributes {dimension_semantics = [#tpu.dimension_semantics<parallel>], iteration_bounds = array<i64: 2>, scalar_prefetch = 0 : i64, scratch_operands = 0 : i64, tpu.core_type = #tpu.core_type<tc>, window_params = [{transform_indices = @transform_0, window_bounds = array<i64: 8, 2, 8, 128>}, {pipeline_mode = #tpu.pipeline_mode<synchronous>, transform_indices = @transform_1, window_bounds = array<i64: 128, 128>}, {pipeline_mode = #tpu.pipeline_mode<synchronous>, transform_indices = @transform_2, window_bounds = array<i64: 128, 128>}, {pipeline_mode = #tpu.pipeline_mode<synchronous>, transform_indices = @transform_3, window_bounds = array<i64: 1, 128>}, {transform_indices = @transform_4, window_bounds = array<i64: 64, 128>}]} {
    %c0 = arith.constant 0 : index
    %c0_0 = arith.constant 0 : index
    %c0_1 = arith.constant 0 : index
    %c0_2 = arith.constant 0 : index
    %0 = vector.load %arg1[%c0, %c0_0, %c0_1, %c0_2] : memref<8x2x8x128xf32, #tpu.memory_space<vmem>>, vector<8x2x8x128xf32>
    %1 = vector.extract_strided_slice %0 {offsets = [0, 0, 0, 0], sizes = [8, 1, 8, 128], strides = [1, 1, 1, 1]} : vector<8x2x8x128xf32> to vector<8x1x8x128xf32>
    %2 = vector.shape_cast %1 : vector<8x1x8x128xf32> to vector<8x8x128xf32>
    %3 = vector.shape_cast %2 : vector<8x8x128xf32> to vector<64x128xf32>
    %4 = vector.extract_strided_slice %0 {offsets = [0, 1, 0, 0], sizes = [8, 1, 8, 128], strides = [1, 1, 1, 1]} : vector<8x2x8x128xf32> to vector<8x1x8x128xf32>
    %5 = vector.shape_cast %4 : vector<8x1x8x128xf32> to vector<8x8x128xf32>
    %6 = vector.shape_cast %5 : vector<8x8x128xf32> to vector<64x128xf32>
    %cst = arith.constant dense<0.000000e+00> : vector<64xf32>
    %7 = vector.multi_reduction <add>, %3, %cst [1] : vector<64x128xf32> to vector<64xf32>
    %8 = vector.shape_cast %7 : vector<64xf32> to vector<64x1xf32>
    %cst_3 = arith.constant dense<0.000000e+00> : vector<64xf32>
    %9 = vector.multi_reduction <add>, %6, %cst_3 [1] : vector<64x128xf32> to vector<64xf32>
    %10 = vector.shape_cast %9 : vector<64xf32> to vector<64x1xf32>
    %11 = arith.addf %8, %10 : vector<64x1xf32>
    %cst_4 = arith.constant 3.906250e-03 : f32
    %12 = vector.broadcast %cst_4 : f32 to vector<64x1xf32>
    %13 = arith.mulf %11, %12 : vector<64x1xf32>
    %14 = vector.broadcast %13 : vector<64x1xf32> to vector<64x128xf32>
    %15 = arith.subf %3, %14 : vector<64x128xf32>
    %16 = vector.broadcast %13 : vector<64x1xf32> to vector<64x128xf32>
    %17 = arith.subf %6, %16 : vector<64x128xf32>
    %18 = arith.mulf %15, %15 : vector<64x128xf32>
    %cst_5 = arith.constant dense<0.000000e+00> : vector<64xf32>
    %19 = vector.multi_reduction <add>, %18, %cst_5 [1] : vector<64x128xf32> to vector<64xf32>
    %20 = vector.shape_cast %19 : vector<64xf32> to vector<64x1xf32>
    %21 = arith.mulf %17, %17 : vector<64x128xf32>
    %cst_6 = arith.constant dense<0.000000e+00> : vector<64xf32>
    %22 = vector.multi_reduction <add>, %21, %cst_6 [1] : vector<64x128xf32> to vector<64xf32>
    %23 = vector.shape_cast %22 : vector<64xf32> to vector<64x1xf32>
    %24 = arith.addf %20, %23 : vector<64x1xf32>
    %cst_7 = arith.constant 3.906250e-03 : f32
    %25 = vector.broadcast %cst_7 : f32 to vector<64x1xf32>
    %26 = arith.mulf %24, %25 : vector<64x1xf32>
    %cst_8 = arith.constant 9.99999974E-6 : f32
    %27 = vector.broadcast %cst_8 : f32 to vector<64x1xf32>
    %28 = arith.addf %26, %27 : vector<64x1xf32>
    %29 = math.rsqrt %28 : vector<64x1xf32>
    %30 = vector.broadcast %29 : vector<64x1xf32> to vector<64x128xf32>
    %31 = arith.mulf %15, %30 : vector<64x128xf32>
    %32 = arith.truncf %31 : vector<64x128xf32> to vector<64x128xbf16>
    %33 = vector.broadcast %29 : vector<64x1xf32> to vector<64x128xf32>
    %34 = arith.mulf %17, %33 : vector<64x128xf32>
    %35 = arith.truncf %34 : vector<64x128xf32> to vector<64x128xbf16>
    %c0_9 = arith.constant 0 : index
    %c0_10 = arith.constant 0 : index
    %36 = vector.load %arg2[%c0_9, %c0_10] : memref<128x128xbf16, #tpu.memory_space<vmem>>, vector<128x128xbf16>
    %cst_11 = arith.constant dense<0.000000e+00> : vector<64x128xf32>
    %37 = tpu.matmul %32, %36, %cst_11 {dimension_numbers = #tpu.dot_dimension_numbers<[1], [0], [0], [1], [0, 0, 1, 1], [], []>} : vector<64x128xbf16>, vector<128x128xbf16>, vector<64x128xf32> -> vector<64x128xf32>
    %c0_12 = arith.constant 0 : index
    %c0_13 = arith.constant 0 : index
    %38 = vector.load %arg3[%c0_12, %c0_13] : memref<128x128xbf16, #tpu.memory_space<vmem>>, vector<128x128xbf16>
    %cst_14 = arith.constant dense<0.000000e+00> : vector<64x128xf32>
    %39 = tpu.matmul %35, %38, %cst_14 {dimension_numbers = #tpu.dot_dimension_numbers<[1], [0], [0], [1], [0, 0, 1, 1], [], []>} : vector<64x128xbf16>, vector<128x128xbf16>, vector<64x128xf32> -> vector<64x128xf32>
    %40 = arith.addf %37, %39 : vector<64x128xf32>
    %c0_15 = arith.constant 0 : index
    %c0_16 = arith.constant 0 : index
    %41 = vector.load %arg4[%c0_15, %c0_16] : memref<1x128xf32, #tpu.memory_space<vmem>>, vector<1x128xf32>
    %42 = vector.broadcast %41 : vector<1x128xf32> to vector<64x128xf32>
    %43 = arith.addf %40, %42 : vector<64x128xf32>
    %c0_17 = arith.constant 0 : index
    %c0_18 = arith.constant 0 : index
    %44 = vector.load %arg5[%c0_17, %c0_18] : memref<64x128xf32, #tpu.memory_space<vmem>>, vector<64x128xf32>
    tpu.vector_store %arg5[%c0_17, %c0_18], %43 {strides = array<i32>} : memref<64x128xf32, #tpu.memory_space<vmem>>, vector<64x128xf32>,
    return
  }
  func.func @transform_0(%arg0: i32) -> (i32, i32, i32, i32) {
    %c0_i32 = arith.constant 0 : i32
    %c0_i32_0 = arith.constant 0 : i32
    %c0_i32_1 = arith.constant 0 : i32
    %c0_i32_2 = arith.constant 0 : i32
    return %arg0, %c0_i32, %c0_i32_0, %c0_i32_1 : i32, i32, i32, i32
  }
  func.func @transform_1(%arg0: i32) -> (i32, i32) {
    %c0_i32 = arith.constant 0 : i32
    %c0_i32_0 = arith.constant 0 : i32
    %c0_i32_1 = arith.constant 0 : i32
    return %c0_i32, %c0_i32_0 : i32, i32
  }
  func.func @transform_2(%arg0: i32) -> (i32, i32) {
    %c0_i32 = arith.constant 0 : i32
    %c0_i32_0 = arith.constant 0 : i32
    %c0_i32_1 = arith.constant 0 : i32
    return %c0_i32, %c0_i32_0 : i32, i32
  }
  func.func @transform_3(%arg0: i32) -> (i32, i32) {
    %c0_i32 = arith.constant 0 : i32
    %c0_i32_0 = arith.constant 0 : i32
    %c0_i32_1 = arith.constant 0 : i32
    return %c0_i32, %c0_i32_0 : i32, i32
  }
  func.func @transform_4(%arg0: i32) -> (i32, i32) {
    %c0_i32 = arith.constant 0 : i32
    %c0_i32_0 = arith.constant 0 : i32
    return %arg0, %c0_i32 : i32, i32
  }
}

</mosaic_0001>

<bundles_post_ra>
// kernel: tpu_custom_call.1
= control target key start
LH: loop header
LB: loop body
LE: loop exit
PB: predicated region body
PF: predicated region fallthrough
CT: control target
= control target key end

     0   :  { %9 = vsyncpa [#allocation3], 0  ;;  %s1554_s0 = inlined_call_operand.hbm [shape: f32[16,2,8,128], index: 0, kind: input, shape index: {}]   ;;  %s1555_s1 = inlined_call_operand.hbm [shape: bf16[128,128], index: 1, kind: input, shape index: {}]   ;;  %s1556_s2 = inlined_call_operand.hbm [shape: bf16[128,128], index: 2, kind: input, shape index: {}]   ;;  %s1557_s3 = inlined_call_operand.vmem [shape: f32[1,128], index: 3, kind: input, shape index: {}]   ;;  %s1558_s4 = inlined_call_operand.hbm [shape: f32[128,128], index: 4, kind: output, shape index: {}]  }
   0x1   :  { %11 = vsyncpa [#allocation3 + $0x1], 0 }
   0x2   :  { %12 = vsyncpa [#allocation6], 0 }
   0x3   :  { %13 = vsyncpa [#allocation4], 0 }
   0x4   :  { %15 = vsyncpa [#allocation4 + $0x1], 0  ;;  %s1221_s15 = smov 0   ;;  %s1223_s16 = smov 0  }
   0x5   :  { %s1225_s17 = smov 0   ;;  %s1227_s18 = smov 0  }
   0x6 LB: > { %s1242_s19 = sadd.s32 4294967295, %s1184_s18   ;;  %s820_s20 = sadd.s32 4294967294, %s1184_s18   ;;  %s1184_s18 = sphi %s1227_s18, %s1580_s18   ;;  %s1180_s17 = sphi %s1225_s17, %s1579_s17   ;;  %s1176_s16 = sphi %s1223_s16, %s1578_s16   ;;  %s1172_s15 = sphi %s1221_s15, %s1577_s15  }
   0x7   : > { %p41_p0 = scmp.ne.s32.totalorder %s1176_s16, %s1172_s15  ;;  %p1559_p1 = scmp.eq.s32.totalorder %s1242_s19, 0 }
   0x8   : > { %p134_p3 = scmp.eq.s32.totalorder %s820_s20, 1  ;;  %p821_p5 = scmp.ge.s32.totalorder %s1184_s18, 1 }
   0x9   : > { %p1251_p4 = por %p1559_p1, %p41_p0  ;;  %p141_p7 = scmp.lt.s32.totalorder %s1184_s18, 3 }
   0xa   : > { %p1256_p6 = por %p134_p3, %p41_p0  ;;  %s1186_s24 = smov [#allocation5]  }
   0xb   : > { %s1563_s21 = scalar_select %p1251_p4, 1, 0 }
   0xc   : > { %s1564_s22 = scalar_select %p1256_p6, 1, 0 }
   0xd   : > { %p1261_p8 = pnand %p821_p5, %p141_p7  ;;  %s153_s25 = sshll.u32 %s1186_s24, 4  ;;  %s154_s25 = int_to_ptr.vmem [resolvable:$true] %s153_s25 }
   0xe   : > { %s1187_s27 = smov [#allocation7]   ;;  %s1047_s29 = scalar_lea.vmem %s154_s25, 1024 }
   0xf   : > { %s1565_s23 = scalar_select %p1261_p8, 1, 0 }
  0x10   : > { %p943_p9 = pneg %p1261_p8  ;;  %s166_s28 = sshll.u32 %s1187_s27, 4  ;;  %s167_s28 = int_to_ptr.vmem [resolvable:$true] %s166_s28 }
  0x11   : > { %p1048_p13 = scmp.ne.s32.totalorder %s154_s25, %s1047_s29  ;;  %p1055_p5 = scmp.lt.s32.totalorder %s154_s25, %s154_s25 }
  0x12   : > { %p1270_p11 = pnand %p943_p9, %p1559_p1  ;;  %p1056_p7 = scmp.lt.s32.totalorder %s1047_s29, %s1047_s29 }
  0x14   : > { %p1038_p12 = pneg %p1270_p11  ;;  %p1057_p10 = por %p1056_p7, %p1055_p5 }
  0x16   : > { %p1050_p0 = pnand %p1048_p13, %p1038_p12 }
  0x18   : > { %p1051_p3 = pneg %p1050_p0 }
  0x1a   : > { %p1058_p9 = pnand %p1057_p10, %p1051_p3 }
  0x1c   : > { %1061 = shalt.err (!%p1058_p9)
}
  0x1d   : > { %s1188_s30 = smov 64   ;;  %s1189_s5 = smov 4  }
  0x1e   : > { %946 = dma.hbm_to_vmem [thread:$0]  (!%p1270_p11), %s1555_s1, 1024, %s154_s25, [#allocation6], %s1188_s30, %s1188_s30, %s1189_s5  }
  0x1f   : > { %s1073_s8 = scalar_lea.vmem %s167_s28, 1024  ;;  %p1081_p2 = scmp.lt.s32.totalorder %s167_s28, %s167_s28 }
  0x20   : > { %p1074_p1 = scmp.ne.s32.totalorder %s167_s28, %s1073_s8  ;;  %p1082_p6 = scmp.lt.s32.totalorder %s1073_s8, %s1073_s8 }
  0x22   : > { %p1076_p13 = pnand %p1074_p1, %p1038_p12  ;;  %p1083_p5 = por %p1082_p6, %p1081_p2 }
  0x24   : > { %p1077_p0 = pneg %p1076_p13 }
  0x26   : > { %p1084_p10 = pnand %p1083_p5, %p1077_p0 }
  0x28   : > { %1087 = shalt.err (!%p1084_p10)
}
  0x29   : > { %949 = dma.hbm_to_vmem [thread:$0]  (!%p1270_p11), %s1556_s2, 1024, %s167_s28, [#allocation6], %s1188_s30, %s1188_s30, %s1189_s5  }
  0x2a   : > { %s1293_s11 = sadd.s32 1, %s1184_s18   ;;  %s28_s12 = sadd.s32 1, %s1180_s17 }
  0x2b   : > { %s25_s13 = ssub.s32 %s1184_s18, %s1293_s11  ;;  %p35_p1 = scmp.ne.s32.totalorder %s1180_s17, %s1176_s16 }
  0x2c   : > { %p26_p2 = scmp.eq.s32.totalorder %s25_s13, 0  ;;  %p36_p6 = scmp.eq.s32.totalorder %s1184_s18, 0 }
  0x2d   : > { %p1567_p12 = scmp.eq.s32.totalorder %s1242_s19, 1  ;;  %p960_p7 = scmp.lt.s32.totalorder %s1184_s18, 2 }
  0x2e   : > { %s1309_s20 = scalar_select %p26_p2, %s1180_s17, %s28_s12  }
  0x2f   : > { %p1303_p3 = por %p1567_p12, %p35_p1  ;;  %p37_p9 = por %p36_p6, %p35_p1 }
  0x30   : > { %s183_s24 = sand.u32 1, %s1180_s17   ;;  %s857_s26 = sshll.u32 %s1184_s18, 11 }
  0x31   : > { %s1568_s14 = scalar_select %p1303_p3, 1, 0 }
  0x32   : > { %s825_s25 = sshll.u32 %s183_s24, 7  ;;  %s1316_s29 = scalar_lea.hbm %s1554_s0, %s857_s26 }
  0x33   : > { %s187_s30 = scalar_lea.vmem [#allocation2], %s825_s25  ;;  %p1320_p11 = pnand %p960_p7, %p37_p9 }
  0x34   : > { %s195_s5 = sshll.u32 %s187_s30, 4  ;;  %s1324_s7 = scalar_lea.sflag [#allocation3], %s183_s24  ;;  %s1318_s5 = int_to_ptr.vmem [resolvable:$true] %s195_s5 }
  0x35   : > { %s1088_s8 = scalar_lea.hbm %s1316_s29, 2048  ;;  %p1090_p0 = pneg %p1320_p11 }
  0x36   : > { %p1089_p13 = scmp.ne.s32.totalorder %s1316_s29, %s1088_s8  ;;  %s1093_s12 = scalar_lea.hbm %s1554_s0, 4096 }
  0x37   : > { %p1094_p1 = scmp.lt.s32.totalorder %s1316_s29, %s1554_s0  ;;  %p1095_p2 = scmp.lt.s32.totalorder %s1093_s12, %s1088_s8 }
  0x38   : > { %p1091_p5 = pnand %p1090_p0, %p1089_p13 }
  0x39   : > { %p1096_p6 = por %p1095_p2, %p1094_p1 }
  0x3a   : > { %p1092_p10 = pneg %p1091_p5 }
  0x3c   : > { %p1097_p12 = pnand %p1096_p6, %p1092_p10 }
  0x3e   : > { %1100 = shalt.err (!%p1097_p12)
}
  0x3f   : > { %s1101_s24 = scalar_lea.vmem %s1318_s5, 2048  ;;  %s1190_s26 = smov [#allocation2]  }
  0x40   : > { %p1102_p7 = scmp.ne.s32.totalorder %s1318_s5, %s1101_s24  ;;  %s1106_s27 = sshll.u32 %s1190_s26, 4  ;;  %s1107_s27 = int_to_ptr.vmem [resolvable:$false] %s1106_s27 }
  0x41   : > { %s1108_s28 = scalar_lea.vmem %s1107_s27, 4096  ;;  %p1109_p5 = scmp.lt.s32.totalorder %s1318_s5, %s1107_s27 }
  0x42   : > { %p1104_p9 = pnand %p1102_p7, %p1090_p0  ;;  %p1110_p3 = scmp.lt.s32.totalorder %s1108_s28, %s1101_s24 }
  0x44   : > { %p1105_p13 = pneg %p1104_p9  ;;  %p1111_p4 = por %p1110_p3, %p1109_p5 }
  0x46   : > { %p1112_p8 = pnand %p1111_p4, %p1105_p13 }
  0x48   : > { %1115 = shalt.err (!%p1112_p8)
}
  0x49   : > { %s1191_s30 = smov 128   ;;  %s1192_s8 = smov 8  }
  0x4a   : > { %953 = dma.hbm_to_vmem [thread:$0]  (!%p1320_p11), %s1316_s29, 2048, %s1318_s5, %s1324_s7, %s1191_s30, %s1191_s30, %s1192_s8  }
  0x4b   : > { %p1570_p0 = scmp.ne.s32.totalorder %s1565_s23, 0 }
  0x4c   : > { %s1348_s9 = sand.u32 (!%p1570_p0), 1, %s1176_s16   ;;  %p1571_p4 = scmp.ne.s32.totalorder (!%p1570_p0), %s1563_s21, 0 }
  0x4d   : > { %207 = sbr.rel (%p1570_p0) target bundleno = 645 (0x285), region = 36  ;;  %s830_s10 = sshll.u32 (!%p1570_p0), %s1348_s9, 7 }
  0x4e   : > { %s210_s12 = scalar_lea.sflag (!%p1570_p0), [#allocation3], %s1348_s9  ;;  %s1352_s13 = scalar_lea.vmem (!%p1570_p0), [#allocation2], %s830_s10 }
  0x52   : > { %1159 = dma.done.wait (%p1571_p4), %s210_s12, 2048  }
  0x53   : > { %1161 = vsyncadd (%p1571_p4), %s210_s12, 4294965248  ;;  %p1572_p8 = scmp.eq.s32.totalorder %s1242_s19, 0 }
  0x55   : > { %1163 = dma.done.wait (%p1572_p8), [#allocation6], 2048   ;;  %p1573_p3 = pmov %p1572_p8 }
  0x56   : > { %v250_v0 = vld [vmem:[%s1352_s13 + $0x8] sm:$0xff]  ;;  %v249_v1 = vld [vmem:[%s1352_s13] sm:$0xff]  ;;  %v252_v2 = vld [vmem:[%s1352_s13 + $0x18] sm:$0xff]  ;;  %s833_s21 = sshll.u32 %s1348_s9, 6  ;;  %s858_s7 = sshll.u32 %s1242_s19, 10 }
  0x57   : > { %1165 = vsyncadd (%p1573_p3), [#allocation6], 4294965248  ;;  %281 = vadd.xlane.f32.xlu1 %v250_v0  ;;  %265 = vadd.xlane.f32.xlu0 %v249_v1  ;;  %v251_v3 = vld [vmem:[%s1352_s13 + $0x10] sm:$0xff]  ;;  %v253_v5 = vld [vmem:[%s1352_s13 + $0x20] sm:$0xff]  ;;  %s1494_s5 = scalar_lea.vmem [#allocation8], %s833_s21  ;;  %s1509_s26 = scalar_lea.hbm %s1558_s4, %s858_s7 }
  0x58   : > { %v255_v4 = vld [vmem:[%s1352_s13 + $0x30] sm:$0xff]  ;;  %v256_v6 = vld [vmem:[%s1352_s13 + $0x38] sm:$0xff]  ;;  %v254_v7 = vld [vmem:[%s1352_s13 + $0x28] sm:$0xff]  ;;  %s728_s6 = sshll.u32 %s1494_s5, 4  ;;  %s715_s27 = scalar_lea.sflag [#allocation4], %s1348_s9  ;;  %s1503_s6 = int_to_ptr.vmem [resolvable:$true] %s728_s6 }
  0x59   : > { %v1371_v8 = vld [vmem:[%s1352_s13 + $0x50] sm:$0xff]  ;;  %v1374_v9 = vld [vmem:[%s1352_s13 + $0x40] sm:$0xff]  ;;  %v1379_v10 = vld [vmem:[%s1352_s13 + $0x58] sm:$0xff]  ;;  %s1116_s19 = scalar_lea.vmem %s1503_s6, 1024  ;;  %p1574_p10 = scmp.ne.s32.totalorder %s1568_s14, 0 }
  0x5a   : > { %v1382_v11 = vld [vmem:[%s1352_s13 + $0x48] sm:$0xff]  ;;  %v1387_v12 = vld [vmem:[%s1352_s13 + $0x70] sm:$0xff]  ;;  %v1390_v13 = vld [vmem:[%s1352_s13 + $0x60] sm:$0xff]  ;;  %p1117_p11 = scmp.ne.s32.totalorder %s1503_s6, %s1116_s19  ;;  %s1193_s28 = smov [#allocation8]  }
  0x5b   : > { %283 = vadd.xlane.f32.xlu1 %v252_v2  ;;  %267 = vadd.xlane.f32.xlu0 %v251_v3  ;;  %v1395_v14 = vld [vmem:[%s1352_s13 + $0x78] sm:$0xff]  ;;  %v1398_v15 = vld [vmem:[%s1352_s13 + $0x68] sm:$0xff]  ;;  %s1120_s30 = sshll.u32 %s1193_s28, 4  ;;  %s1121_s30 = int_to_ptr.vmem [resolvable:$false] %s1120_s30 }
  0x5c   : > { %v1004_v60 = vld [vmem:[#allocation7 + $0x38] sm:$0xff]   ;;  %p1118_p1 = pnand %p1117_p11, %p1574_p10  ;;  %s1122_s8 = scalar_lea.vmem %s1121_s30, 2048 }
  0x5d   : > { %v1005_v61 = vld [vmem:[#allocation5 + $0x38] sm:$0xff]   ;;  %883 = vmatprep.subr.bf16.mxu0 %v1004_v60  ;;  %p1123_p6 = scmp.lt.s32.totalorder %s1503_s6, %s1121_s30  ;;  %p1124_p12 = scmp.lt.s32.totalorder %s1122_s8, %s1116_s19 }
  0x5e   : > { %907 = vmatprep.subr.bf16.mxu1 %v1005_v61  ;;  %884 = vmatpush3.bf16.msra.mxu0 %v1004_v60  ;;  %p1119_p2 = pneg %p1118_p1 }
  0x5f   : > { %271 = vadd.xlane.f32.xlu1 %v255_v4  ;;  %269 = vadd.xlane.f32.xlu0 %v253_v5  ;;  %p1125_p7 = por %p1124_p12, %p1123_p6 }
  0x60   : > { %908 = vmatpush3.bf16.msra.mxu1 %v1005_v61 }
  0x61   : > { %p1126_p9 = pnand %p1125_p7, %p1119_p2 }
  0x63   : > { %287 = vadd.xlane.f32.xlu1 %v256_v6  ;;  %285 = vadd.xlane.f32.xlu0 %v254_v7 }
  0x67   : > { %275 = vadd.xlane.f32.xlu1 %v1371_v8  ;;  %273 = vadd.xlane.f32.xlu0 %v1374_v9 }
  0x6b   : > { %291 = vadd.xlane.f32.xlu1 %v1379_v10  ;;  %289 = vadd.xlane.f32.xlu0 %v1382_v11 }
  0x6f   : > { %279 = vadd.xlane.f32.xlu1 %v1387_v12  ;;  %277 = vadd.xlane.f32.xlu0 %v1390_v13 }
  0x73   : > { %295 = vadd.xlane.f32.xlu1 %v1395_v14  ;;  %293 = vadd.xlane.f32.xlu0 %v1398_v15 }
  0xe0   : > { %v282_v16 = vpop.xlane.xlu1 %281  ;;  %v266_v17 = vpop.xlane.xlu0 %265 }
  0xe1   : > { %v297_v18 = vadd.f32 %v282_v16, %v266_v17 }
  0xe3   : > { %v305_v19 = vmul.f32 0.00390625, %v297_v18  ;;  %v1008_v18 = vld [vmem:[#allocation7 + $0x28] sm:$0xff]  }
  0xe4   : > { %v284_v20 = vpop.xlane.xlu1 %283  ;;  %v268_v21 = vpop.xlane.xlu0 %267 }
  0xe5   : > { %v1402_v22 = vsub.f32 %v249_v1, %v305_v19  ;;  %v298_v23 = vadd.f32 %v284_v20, %v268_v21  ;;  %v1404_v24 = vsub.f32 %v250_v0, %v305_v19  ;;  %v1009_v19 = vld [vmem:[#allocation5 + $0x28] sm:$0xff]  }
  0xe7   : > { %v306_v25 = vmul.f32 0.00390625, %v298_v23  ;;  %v329_v26 = vmul.f32 %v1402_v22, %v1402_v22  ;;  %v353_v31 = vmul.f32 %v1404_v24, %v1404_v24 }
  0xe8   : > { %v272_v27 = vpop.xlane.xlu1 %271  ;;  %v270_v28 = vpop.xlane.xlu0 %269 }
  0xe9   : > { %v1408_v29 = vsub.f32 %v251_v3, %v306_v25  ;;  %337 = vadd.xlane.f32.xlu0 %v329_v26  ;;  %v1410_v30 = vsub.f32 %v252_v2, %v306_v25  ;;  %v1011_v25 = vld [vmem:[#allocation5 + $0x20] sm:$0xff]  }
  0xeb   : > { %v330_v32 = vmul.f32 %v1408_v29, %v1408_v29  ;;  %v354_v39 = vmul.f32 %v1410_v30, %v1410_v30 }
  0xec   : > { %v288_v33 = vpop.xlane.xlu1 %287  ;;  %v286_v34 = vpop.xlane.xlu0 %285 }
  0xed   : > { %v300_v35 = vadd.f32 %v288_v33, %v272_v27  ;;  %v299_v36 = vadd.f32 %v286_v34, %v270_v28  ;;  %361 = vadd.xlane.f32.xlu0 %v353_v31  ;;  %339 = vadd.xlane.f32.xlu1 %v330_v32  ;;  %v1013_v27 = vld [vmem:[#allocation5 + $0x18] sm:$0xff]   ;;  %v1014_v28 = vld [vmem:[#allocation7 + $0x10] sm:$0xff]   ;;  %v1016_v32 = vld [vmem:[#allocation7 + $0x8] sm:$0xff]  }
  0xee   : > { %v1015_v31 = vld [vmem:[#allocation5 + $0x10] sm:$0xff]   ;;  %v1017_v33 = vld [vmem:[#allocation5 + $0x8] sm:$0xff]   ;;  %v1018_v34 = vld [vmem:[#allocation7] sm:$0xff]  }
  0xef   : > { %v308_v37 = vmul.f32 0.00390625, %v300_v35  ;;  %v307_v38 = vmul.f32 0.00390625, %v299_v36  ;;  %v1019_v35 = vld [vmem:[#allocation5] sm:$0xff]  }
  0xf0   : > { %v276_v40 = vpop.xlane.xlu1 %275  ;;  %v274_v41 = vpop.xlane.xlu0 %273 }
  0xf1   : > { %v1418_v42 = vsub.f32 %v255_v4, %v308_v37  ;;  %v1420_v43 = vsub.f32 %v253_v5, %v307_v38  ;;  %363 = vadd.xlane.f32.xlu1 %v354_v39  ;;  %v1422_v44 = vsub.f32 %v256_v6, %v308_v37  ;;  %v1428_v47 = vsub.f32 %v254_v7, %v307_v38  ;;  %v1006_v6 = vld [vmem:[#allocation7 + $0x30] sm:$0xff]  }
  0xf2   : > { %v1007_v7 = vld [vmem:[#allocation5 + $0x30] sm:$0xff]   ;;  %885 = vmatprep.subr.bf16.mxu0 %v1006_v6 }
  0xf3   : > { %v332_v45 = vmul.f32 %v1418_v42, %v1418_v42  ;;  %v331_v46 = vmul.f32 %v1420_v43, %v1420_v43  ;;  %v356_v54 = vmul.f32 %v1422_v44, %v1422_v44  ;;  %v355_v57 = vmul.f32 %v1428_v47, %v1428_v47  ;;  %909 = vmatprep.subr.bf16.mxu1 %v1007_v7 }
  0xf4   : > { %v292_v48 = vpop.xlane.xlu1 %291  ;;  %v290_v49 = vpop.xlane.xlu0 %289  ;;  %886 = vmatpush3.bf16.msra.mxu0 %v1006_v6  ;;  %910 = vmatpush3.bf16.msra.mxu1 %v1007_v7 }
  0xf5   : > { %v302_v50 = vadd.f32 %v292_v48, %v276_v40  ;;  %v301_v51 = vadd.f32 %v290_v49, %v274_v41  ;;  %343 = vadd.xlane.f32.xlu1 %v332_v45  ;;  %341 = vadd.xlane.f32.xlu0 %v331_v46 }
  0xf6   : > { %887 = vmatprep.subr.bf16.mxu0 %v1008_v18  ;;  %911 = vmatprep.subr.bf16.mxu1 %v1009_v19 }
  0xf7   : > { %v310_v52 = vmul.f32 0.00390625, %v302_v50  ;;  %v309_v53 = vmul.f32 0.00390625, %v301_v51 }
  0xf8   : > { %v280_v55 = vpop.xlane.xlu1 %279  ;;  %v278_v56 = vpop.xlane.xlu0 %277  ;;  %888 = vmatpush3.bf16.msra.mxu0 %v1008_v18  ;;  %912 = vmatpush3.bf16.msra.mxu1 %v1009_v19 }
  0xf9   : > { %v1435_v58 = vsub.f32 %v1371_v8, %v310_v52  ;;  %v1438_v59 = vsub.f32 %v1374_v9, %v309_v53  ;;  %367 = vadd.xlane.f32.xlu1 %v356_v54  ;;  %365 = vadd.xlane.f32.xlu0 %v355_v57  ;;  %v1441_v62 = vsub.f32 %v1379_v10, %v310_v52 }
  0xfa   : > { %v1448_v1 = vsub.f32 %v1382_v11, %v309_v53  ;;  %913 = vmatprep.subr.bf16.mxu1 %v1011_v25 }
  0xfb   : > { %v334_v63 = vmul.f32 %v1435_v58, %v1435_v58  ;;  %v333_v0 = vmul.f32 %v1438_v59, %v1438_v59  ;;  %v358_v10 = vmul.f32 %v1441_v62, %v1441_v62 }
  0xfc   : > { %v296_v2 = vpop.xlane.xlu1 %295  ;;  %v294_v3 = vpop.xlane.xlu0 %293  ;;  %v357_v11 = vmul.f32 %v1448_v1, %v1448_v1  ;;  %914 = vmatpush3.bf16.msra.mxu1 %v1011_v25 }
  0xfd   : > { %v304_v4 = vadd.f32 %v296_v2, %v280_v55  ;;  %v303_v5 = vadd.f32 %v294_v3, %v278_v56  ;;  %347 = vadd.xlane.f32.xlu1 %v334_v63  ;;  %345 = vadd.xlane.f32.xlu0 %v333_v0 }
  0xfe   : > { %915 = vmatprep.subr.bf16.mxu1 %v1013_v27 }
  0xff   : > { %v312_v8 = vmul.f32 0.00390625, %v304_v4  ;;  %v311_v9 = vmul.f32 0.00390625, %v303_v5 }
 0x100   : > { %916 = vmatpush3.bf16.msra.mxu1 %v1013_v27 }
 0x101   : > { %v1455_v16 = vsub.f32 %v1387_v12, %v312_v8  ;;  %v1458_v17 = vsub.f32 %v1390_v13, %v311_v9  ;;  %371 = vadd.xlane.f32.xlu1 %v358_v10  ;;  %369 = vadd.xlane.f32.xlu0 %v357_v11  ;;  %v1461_v20 = vsub.f32 %v1395_v14, %v312_v8  ;;  %v1010_v13 = vld [vmem:[#allocation7 + $0x20] sm:$0xff]  }
 0x102   : > { %v1468_v12 = vsub.f32 %v1398_v15, %v311_v9  ;;  %889 = vmatprep.subr.bf16.mxu0 %v1010_v13  ;;  %v1012_v15 = vld [vmem:[#allocation7 + $0x18] sm:$0xff]   ;;  %917 = vmatprep.subr.bf16.mxu1 %v1015_v31 }
 0x103   : > { %v336_v21 = vmul.f32 %v1455_v16, %v1455_v16  ;;  %v335_v23 = vmul.f32 %v1458_v17, %v1458_v17  ;;  %v360_v14 = vmul.f32 %v1461_v20, %v1461_v20  ;;  %890 = vmatpush3.bf16.msra.mxu0 %v1010_v13 }
 0x104   : > { %v359_v26 = vmul.f32 %v1468_v12, %v1468_v12  ;;  %891 = vmatprep.subr.bf16.mxu0 %v1012_v15  ;;  %918 = vmatpush3.bf16.msra.mxu1 %v1015_v31 }
 0x105   : > { %351 = vadd.xlane.f32.xlu1 %v336_v21  ;;  %349 = vadd.xlane.f32.xlu0 %v335_v23 }
 0x106   : > { %919 = vmatprep.subr.bf16.mxu1 %v1017_v33 }
 0x107   : > { %892 = vmatpush3.bf16.msra.mxu0 %v1012_v15 }
 0x108   : > { %893 = vmatprep.subr.bf16.mxu0 %v1014_v28  ;;  %920 = vmatpush3.bf16.msra.mxu1 %v1017_v33 }
 0x109   : > { %375 = vadd.xlane.f32.xlu1 %v360_v14  ;;  %373 = vadd.xlane.f32.xlu0 %v359_v26 }
 0x10a   : > { %921 = vmatprep.subr.bf16.mxu1 %v1019_v35 }
 0x10b   : > { %894 = vmatpush3.bf16.msra.mxu0 %v1014_v28 }
 0x10c   : > { %895 = vmatprep.subr.bf16.mxu0 %v1016_v32  ;;  %922 = vmatpush3.bf16.msra.mxu1 %v1019_v35 }
 0x10f   : > { %896 = vmatpush3.bf16.msra.mxu0 %v1016_v32 }
 0x110   : > { %897 = vmatprep.subr.bf16.mxu0 %v1018_v34 }
 0x113   : > { %898 = vmatpush3.bf16.msra.mxu0 %v1018_v34 }
 0x172   : > { %v338_v36 = vpop.xlane.xlu0 %337 }
 0x176   : > { %v340_v37 = vpop.xlane.xlu1 %339  ;;  %v362_v38 = vpop.xlane.xlu0 %361 }
 0x177   : > { %v377_v39 = vadd.f32 %v362_v38, %v338_v36 }
 0x179   : > { %v385_v40 = vmul.f32 0.00390625, %v377_v39 }
 0x17a   : > { %v364_v41 = vpop.xlane.xlu1 %363 }
 0x17b   : > { %v393_v45 = vadd.f32 1e-05, %v385_v40  ;;  %v378_v46 = vadd.f32 %v364_v41, %v340_v37 }
 0x17d   : > { %v386_v48 = vmul.f32 0.00390625, %v378_v46  ;;  %1020 = vrsqrt.f32 %v393_v45 }
 0x17e   : > { %v344_v49 = vpop.xlane.xlu1 %343  ;;  %v342_v50 = vpop.xlane.xlu0 %341 }
 0x17f   : > { %v394_v51 = vadd.f32 1e-05, %v386_v48 }
 0x181   : > { %1022 = vrsqrt.f32 %v394_v51 }
 0x182   : > { %v368_v52 = vpop.xlane.xlu1 %367  ;;  %v366_v54 = vpop.xlane.xlu0 %365 }
 0x183   : > { %v380_v53 = vadd.f32 %v368_v52, %v344_v49  ;;  %v379_v55 = vadd.f32 %v366_v54, %v342_v50  ;;  %v850_v54 = vld [vmem:[%s1557_s3] ss:$0 sm:$0xff] }
 0x185   : > { %v388_v56 = vmul.f32 0.00390625, %v380_v53  ;;  %v387_v57 = vmul.f32 0.00390625, %v379_v55 }
 0x186   : > { %v348_v60 = vpop.xlane.xlu1 %347  ;;  %v346_v63 = vpop.xlane.xlu0 %345 }
 0x187   : > { %v396_v61 = vadd.f32 1e-05, %v388_v56  ;;  %v395_v0 = vadd.f32 1e-05, %v387_v57 }
 0x189   : > { %1024 = vrsqrt.f32 %v396_v61 }
 0x18a   : > { %1026 = vrsqrt.f32 %v395_v0  ;;  %v372_v2 = vpop.xlane.xlu1 %371  ;;  %v1021_v3 = vpop.eup %1020 }
 0x18b   : > { %v382_v4 = vadd.f32 %v372_v2, %v348_v60  ;;  %v370_v5 = vpop.xlane.xlu0 %369  ;;  %v421_v11 = vmul.f32 %v1021_v3, %v1404_v24  ;;  %v409_v23 = vmul.f32 %v1021_v3, %v1402_v22 }
 0x18c   : > { %v381_v6 = vadd.f32 %v370_v5, %v346_v63 }
 0x18d   : > { %v390_v7 = vmul.f32 0.00390625, %v382_v4 }
 0x18e   : > { %v1023_v8 = vpop.eup %1022  ;;  %v389_v9 = vmul.f32 0.00390625, %v381_v6  ;;  %v352_v10 = vpop.xlane.xlu1 %351 }
 0x18f   : > { %v398_v18 = vadd.f32 1e-05, %v390_v7  ;;  %v350_v19 = vpop.xlane.xlu0 %349  ;;  %v422_v21 = vmul.f32 %v1023_v8, %v1410_v30  ;;  %v410_v13 = vmul.f32 %v1023_v8, %v1408_v29 }
 0x190   : > { %v397_v25 = vadd.f32 1e-05, %v389_v9 }
 0x191   : > { %1028 = vrsqrt.f32 %v398_v18  ;;  %v429_v14 = vpack.c.bf16 %v422_v21, %v421_v11  ;;  %v417_v26 = vpack.c.bf16 %v410_v13, %v409_v23 }
 0x192   : > { %1030 = vrsqrt.f32 %v397_v25  ;;  %v376_v15 = vpop.xlane.xlu1 %375 }
 0x193   : > { %v384_v27 = vadd.f32 %v376_v15, %v352_v10  ;;  %v374_v28 = vpop.xlane.xlu0 %373  ;;  %899 = vmatprep.mubr.bf16.mxu0 %v429_v14  ;;  %923 = vmatprep.mubr.bf16.mxu1 %v417_v26 }
 0x194   : > { %v383_v31 = vadd.f32 %v374_v28, %v350_v19 }
 0x195   : > { %v392_v24 = vmul.f32 0.00390625, %v384_v27 }
 0x196   : > { %v1025_v32 = vpop.eup %1024  ;;  %v391_v33 = vmul.f32 0.00390625, %v383_v31 }
 0x197   : > { %v1027_v34 = vpop.eup %1026  ;;  %v400_v30 = vadd.f32 1e-05, %v392_v24  ;;  %v424_v22 = vmul.f32 %v1025_v32, %v1422_v44  ;;  %v412_v29 = vmul.f32 %v1025_v32, %v1418_v42 }
 0x198   : > { %v399_v35 = vadd.f32 1e-05, %v391_v33  ;;  %v423_v36 = vmul.f32 %v1027_v34, %v1428_v47  ;;  %v411_v37 = vmul.f32 %v1027_v34, %v1420_v43 }
 0x199   : > { %1032 = vrsqrt.f32 %v400_v30 }
 0x19a   : > { %1034 = vrsqrt.f32 %v399_v35  ;;  %v430_v38 = vpack.c.bf16 %v424_v22, %v423_v36  ;;  %v418_v39 = vpack.c.bf16 %v412_v29, %v411_v37 }
 0x19c   : > { %900 = vmatmul.mubr.bf16.vlgmr.msra.gmra.mxu0 %v430_v38  ;;  %924 = vmatmul.mubr.bf16.vlgmr.msra.gmra.mxu1 %v418_v39 }
 0x19e   : > { %v1029_v40 = vpop.eup %1028 }
 0x19f   : > { %v1031_v41 = vpop.eup %1030  ;;  %v426_v45 = vmul.f32 %v1029_v40, %v1441_v62  ;;  %v414_v46 = vmul.f32 %v1029_v40, %v1435_v58 }
 0x1a0   : > { %v425_v44 = vmul.f32 %v1031_v41, %v1448_v1  ;;  %v413_v42 = vmul.f32 %v1031_v41, %v1438_v59 }
 0x1a2   : > { %v431_v47 = vpack.c.bf16 %v426_v45, %v425_v44  ;;  %v419_v48 = vpack.c.bf16 %v414_v46, %v413_v42 }
 0x1a4   : > { %903 = vmatprep.mubr.bf16.mxu0 %v431_v47  ;;  %927 = vmatprep.mubr.bf16.mxu1 %v419_v48 }
 0x1a6   : > { %v1033_v43 = vpop.eup %1032 }
 0x1a7   : > { %v1035_v49 = vpop.eup %1034  ;;  %v428_v50 = vmul.f32 %v1033_v43, %v1461_v20  ;;  %v416_v51 = vmul.f32 %v1033_v43, %v1455_v16 }
 0x1a8   : > { %v427_v52 = vmul.f32 %v1035_v49, %v1468_v12  ;;  %v415_v62 = vmul.f32 %v1035_v49, %v1458_v17 }
 0x1aa   : > { %v432_v58 = vpack.c.bf16 %v428_v50, %v427_v52  ;;  %v420_v53 = vpack.c.bf16 %v416_v51, %v415_v62 }
 0x1ac   : > { %904 = vmatmul.mubr.bf16.gmra.mxu0 %v432_v58  ;;  %928 = vmatmul.mubr.bf16.gmra.mxu1 %v420_v53 }
 0x25c   : > { %v901_v59 = vpop.f32.mrf.mxu0  ;;  %v925_v1 = vpop.f32.mrf.mxu1 }
 0x25d   : > { %v669_v55 = vadd.f32 %v925_v1, %v901_v59 }
 0x25e   : > { %v547_v56 = vpop.f32.mrf.mxu0  ;;  %v660_v20 = vpop.f32.mrf.mxu1 }
 0x25f   : > { %v700_v57 = vadd.f32 %v850_v54, %v669_v55  ;;  %v661_v16 = vadd.f32 %v660_v20, %v547_v56 }
 0x260   : > { %v902_v60 = vpop.f32.mrf.mxu0  ;;  %v926_v12 = vpop.f32.mrf.mxu1 }
 0x261   : > { %708 = vst [vmem:[%s1494_s5 + $0x10] sm:$0xff] %v700_v57  ;;  %v698_v17 = vadd.f32 %v850_v54, %v661_v16  ;;  %v672_v61 = vadd.f32 %v926_v12, %v902_v60 }
 0x262   : > { %v550_v63 = vpop.f32.mrf.mxu0  ;;  %v663_v0 = vpop.f32.mrf.mxu1 }
 0x263   : > { %706 = vst [vmem:[%s1494_s5] sm:$0xff] %v698_v17  ;;  %v701_v2 = vadd.f32 %v850_v54, %v672_v61  ;;  %v664_v3 = vadd.f32 %v663_v0, %v550_v63 }
 0x265   : > { %709 = vst [vmem:[%s1494_s5 + $0x18] sm:$0xff] %v701_v2  ;;  %v699_v4 = vadd.f32 %v850_v54, %v664_v3 }
 0x267   : > { %707 = vst [vmem:[%s1494_s5 + $0x8] sm:$0xff] %v699_v4 }
 0x26c   : > { %v905_v5 = vpop.f32.mrf.mxu0  ;;  %v929_v6 = vpop.f32.mrf.mxu1 }
 0x26d   : > { %v685_v7 = vadd.f32 %v929_v6, %v905_v5 }
 0x26e   : > { %v563_v8 = vpop.f32.mrf.mxu0  ;;  %v676_v9 = vpop.f32.mrf.mxu1 }
 0x26f   : > { %v704_v10 = vadd.f32 %v850_v54, %v685_v7  ;;  %v677_v11 = vadd.f32 %v676_v9, %v563_v8 }
 0x270   : > { %v906_v18 = vpop.f32.mrf.mxu0  ;;  %v930_v19 = vpop.f32.mrf.mxu1 }
 0x271   : > { %712 = vst [vmem:[%s1494_s5 + $0x30] sm:$0xff] %v704_v10  ;;  %v702_v21 = vadd.f32 %v850_v54, %v677_v11  ;;  %v688_v23 = vadd.f32 %v930_v19, %v906_v18 }
 0x272   : > { %v566_v13 = vpop.f32.mrf.mxu0  ;;  %v679_v25 = vpop.f32.mrf.mxu1 }
 0x273   : > { %710 = vst [vmem:[%s1494_s5 + $0x20] sm:$0xff] %v702_v21  ;;  %v705_v14 = vadd.f32 %v850_v54, %v688_v23  ;;  %v680_v26 = vadd.f32 %v679_v25, %v566_v13 }
 0x275   : > { %713 = vst [vmem:[%s1494_s5 + $0x38] sm:$0xff] %v705_v14  ;;  %v703_v15 = vadd.f32 %v850_v54, %v680_v26 }
 0x277   : > { %711 = vst [vmem:[%s1494_s5 + $0x28] sm:$0xff] %v703_v15 }
 0x278   : > { %1129 = shalt.err (!%p1126_p9)
}
 0x279   : > { %s1130_s10 = scalar_lea.hbm %s1509_s26, 1024  ;;  %s1134_s21 = scalar_lea.hbm %s1558_s4, 2048 }
 0x27a   : > { %p1131_p13 = scmp.ne.s32.totalorder %s1509_s26, %s1130_s10  ;;  %p1135_p4 = scmp.lt.s32.totalorder %s1509_s26, %s1558_s4 }
 0x27b   : > { %p1136_p8 = scmp.lt.s32.totalorder %s1134_s21, %s1130_s10 }
 0x27c   : > { %p1132_p5 = pnand %p1131_p13, %p1574_p10 }
 0x27d   : > { %p1137_p3 = por %p1136_p8, %p1135_p4 }
 0x27e   : > { %p1133_p0 = pneg %p1132_p5 }
 0x280   : > { %p1138_p11 = pnand %p1137_p3, %p1133_p0 }
 0x282   : > { %1141 = shalt.err (!%p1138_p11)
}
 0x283   : > { %s1194_s5 = smov 128   ;;  %s1195_s7 = smov 8  }
 0x284   : > { %941 = dma.vmem_to_hbm [thread:$0]  (%p1574_p10), %s1503_s6, 1024, %s1509_s26, %s715_s27, %s1194_s5, %s1194_s5, %s1195_s7  }
 0x285 PF: > { %s743_s25 = sand.u32 1, %s1172_s15   ;;  %p1575_p1 = scmp.ne.s32.totalorder %s1564_s22, 0 }
 0x286   : > { %p1576_p2 = scmp.ge.s32.totalorder %s1184_s18, 2  ;;  %s744_s24 = scalar_lea.sflag [#allocation4], %s743_s25 }
 0x288   : > { %p955_p6 = pnand %p1576_p2, %p1575_p1 }
 0x28a   : > { %p956_p12 = pneg %p955_p6 }
 0x28c   : > { %1167 = dma.done.wait (%p956_p12), %s744_s24, 1024  }
 0x28d   : > { %1169 = vsyncadd (%p956_p12), %s744_s24, 4294966272  ;;  %p18_p7 = scmp.ge.s32.totalorder %s1293_s11, 4   ;;  %s1577_s15 = smov %s1176_s16 }
 0x28e   : > { %s1578_s16 = smov %s1180_s17  ;;  %s1579_s17 = smov %s1309_s20 }
 0x28f   : > { %s1580_s18 = smov %s1293_s11  ;;  %20 = sbr.rel (!%p18_p7) target bundleno = 6 (0x6), region = 89 }
 0x294   :  { %749 = vsyncpa [#allocation3], 1 }
 0x295   :  { %751 = vsyncpa [#allocation3 + $0x1], 1 }
 0x296   :  { %752 = vsyncpa [#allocation6], 1 }
 0x297   :  { %753 = vsyncpa [#allocation4], 1 }
 0x298   :  { %755 = vsyncpa [#allocation4 + $0x1], 1 }

</bundles_post_ra>
